<compile_context>
chip_gen: v5e
topology: v5e:2x2
jax: 0.10.0
libtpu: 0.0.40
codegen_flags: <defaults>
</compile_context>

<pallas_src>
import functools
import math

import jax
import jax.numpy as jnp
from jax.experimental import pallas as pl
from jax.experimental.pallas import tpu as pltpu

BN_EPS = 1e-5

# Row tile: multiple of 8 sublanes.  512 rows keeps the per-step VMEM footprint
# (double-buffered x tile + f32 y tile + resident W) well under the 32 MiB
# scoped default on every generation (including v7x's 64 MiB physical VMEM)
# while being large enough to approach HBM roofline.
_TM_MAX = 512


def _round_up(x, n):
    return (x + n - 1) // n * n


def _linear_stats_kernel(x_ref, w_ref, b_ref, y_ref, stats_ref, *, tm, m_valid):
    # x_ref:     (tm, C_in)
    # w_ref:     (C_in, tn)   pre-transposed nn.Linear weight slice (resident)
    # b_ref:     (1, tn)
    # y_ref:     (tm, tn)     f32 linear output tile
    # stats_ref: (2, tn)      row 0: sum(y), row 1: sum(y*y); resident over M
    i = pl.program_id(1)

    # Linear on the MXU; operands in their native dtype, f32 accumulation.
    y = jnp.dot(x_ref[...], w_ref[...], preferred_element_type=jnp.float32)
    y = y + b_ref[...]
    y_ref[...] = y

    @pl.when(i == 0)
    def _():
        stats_ref[...] = jnp.zeros_like(stats_ref)

    # Mask padded rows so they do not pollute the batch statistics.
    # (Static branch: only emitted when M was actually padded.)
    if m_valid % tm != 0:
        row = jax.lax.broadcasted_iota(jnp.int32, y.shape, 0) + i * tm
        y = jnp.where(row < m_valid, y, 0.0)

    s = jnp.sum(y, axis=0, keepdims=True)
    sq = jnp.sum(y * y, axis=0, keepdims=True)
    stats_ref[...] += jnp.concatenate([s, sq], axis=0)


def _bn_apply_kernel(y_ref, stats_ref, gamma_ref, beta_ref, o_ref, *, m_valid):
    stats = stats_ref[...]
    inv_m = jnp.float32(1.0 / m_valid)
    mean = stats[0:1, :] * inv_m
    ex2 = stats[1:2, :] * inv_m
    var = jnp.maximum(ex2 - mean * mean, 0.0)       # biased (train-mode) var
    scale = gamma_ref[...] * jax.lax.rsqrt(var + jnp.float32(BN_EPS))
    shift = beta_ref[...] - mean * scale
    out = y_ref[...] * scale + shift                # single FMA-style pass
    # TODO(synk): apply the optional `act` here (e.g. jnp.maximum(out, 0.0));
    # the reference module defaults to act=None.
    o_ref[...] = out.astype(o_ref.dtype)


def linear_bn(x, w, b, gamma, beta):
    """x: (..., C_in) -> (..., C_out).  w: (C_out, C_in) as in nn.Linear."""
    orig_shape = x.shape
    c_in = orig_shape[-1]
    c_out = w.shape[0]
    x2d = x.reshape(-1, c_in)
    m = x2d.shape[0]

    # --- static tiling / padding decisions ---
    c_out_p = _round_up(c_out, 128)                 # lane-dense output channels
    tm = min(_TM_MAX, _round_up(m, 8))              # row tile (sublane multiple)
    m_pad = _round_up(m, tm)
    tn = 256 if c_out_p % 256 == 0 else 128         # MXU-friendly channel tile
    nm = m_pad // tm
    nn = c_out_p // tn

    pad_n = c_out_p - c_out
    x_p = x2d if m_pad == m else jnp.pad(x2d, ((0, m_pad - m), (0, 0)))
    wt = jnp.pad(w.T, ((0, 0), (0, pad_n)))                          # (C_in, C_out_p)
    b2 = jnp.pad(b.astype(jnp.float32), (0, pad_n)).reshape(1, c_out_p)
    g2 = jnp.pad(gamma.astype(jnp.float32), (0, pad_n),
                 constant_values=1.0).reshape(1, c_out_p)
    bt2 = jnp.pad(beta.astype(jnp.float32), (0, pad_n)).reshape(1, c_out_p)

    # Phase A: tiled linear + global per-channel sum / sumsq accumulation.
    y, stats = pl.pallas_call(
        functools.partial(_linear_stats_kernel, tm=tm, m_valid=m),
        out_shape=(
            jax.ShapeDtypeStruct((m_pad, c_out_p), jnp.float32),
            jax.ShapeDtypeStruct((2, c_out_p), jnp.float32),
        ),
        grid_spec=pltpu.PrefetchScalarGridSpec(
            num_scalar_prefetch=0,
            grid=(nn, nm),                           # stat-reduction axis (M) last
            in_specs=[
                pl.BlockSpec((tm, c_in), lambda j, i: (i, 0)),
                pl.BlockSpec((c_in, tn), lambda j, i: (0, j)),   # W resident over M
                pl.BlockSpec((1, tn), lambda j, i: (0, j)),
            ],
            out_specs=[
                pl.BlockSpec((tm, tn), lambda j, i: (i, j)),
                pl.BlockSpec((2, tn), lambda j, i: (0, j)),      # stats accumulator
            ],
        ),
        compiler_params=pltpu.CompilerParams(
            dimension_semantics=("parallel", "arbitrary"),
            vmem_limit_bytes=32 * 1024 * 1024,
        ),
    )(x_p, wt, b2)

    # Phase B: normalize each y tile with the global stats, apply gamma/beta.
    out_p = pl.pallas_call(
        functools.partial(_bn_apply_kernel, m_valid=m),
        out_shape=jax.ShapeDtypeStruct((m_pad, c_out_p), x.dtype),
        grid_spec=pltpu.PrefetchScalarGridSpec(
            num_scalar_prefetch=0,
            grid=(nm, nn),
            in_specs=[
                pl.BlockSpec((tm, tn), lambda i, j: (i, j)),
                pl.BlockSpec((2, tn), lambda i, j: (0, j)),
                pl.BlockSpec((1, tn), lambda i, j: (0, j)),
                pl.BlockSpec((1, tn), lambda i, j: (0, j)),
            ],
            out_specs=pl.BlockSpec((tm, tn), lambda i, j: (i, j)),
        ),
        compiler_params=pltpu.CompilerParams(
            dimension_semantics=("parallel", "parallel"),
            vmem_limit_bytes=32 * 1024 * 1024,
        ),
    )(y, stats, g2, bt2)

    out = out_p[:m, :c_out]
    return out.reshape(orig_shape[:-1] + (c_out,))


def init_params(key, in_channel, out_channel):
    """Deterministic init matching nn.Linear / nn.BatchNorm1d shapes."""
    k_w, k_b = jax.random.split(key)
    bound = 1.0 / math.sqrt(in_channel)
    w = jax.random.uniform(k_w, (out_channel, in_channel),
                           minval=-bound, maxval=bound, dtype=jnp.float32)
    b = jax.random.uniform(k_b, (out_channel,),
                           minval=-bound, maxval=bound, dtype=jnp.float32)
    gamma = jnp.ones((out_channel,), jnp.float32)   # bn.weight
    beta = jnp.zeros((out_channel,), jnp.float32)   # bn.bias
    return w, b, gamma, beta


if __name__ == "__main__":
    key = jax.random.PRNGKey(0)
    k_x, k_p = jax.random.split(key)

    batch, seq, in_channel, out_channel = 2, 8, 32, 64
    x = jax.random.normal(k_x, (batch, seq, in_channel), dtype=jnp.float32)
    w, b, gamma, beta = init_params(k_p, in_channel, out_channel)

    out = linear_bn(x, w, b, gamma, beta)
    out = jax.block_until_ready(out)

    # sanity: shape and reference check in plain JAX
    y_ref = x.reshape(-1, in_channel) @ w.T + b
    mean = jnp.mean(y_ref, axis=0, keepdims=True)
    var = jnp.mean((y_ref - mean) ** 2, axis=0, keepdims=True)
    ref = ((y_ref - mean) / jnp.sqrt(var + BN_EPS)) * gamma + beta
    ref = ref.reshape(batch, seq, out_channel)

    assert out.shape == (batch, seq, out_channel)
    assert jnp.allclose(out, ref, atol=1e-4, rtol=1e-4)
    print("KERNEL_OK")
</pallas_src>

<mosaic_0001>
module attributes {stable_mosaic.version = 11 : i64} {
  func.func @_linear_stats_kernel(%arg0: i32, %arg1: i32, %arg2: memref<16x32xf32, #tpu.memory_space<vmem>>, %arg3: memref<32x128xf32, #tpu.memory_space<vmem>>, %arg4: memref<1x128xf32, #tpu.memory_space<vmem>>, %arg5: memref<16x128xf32, #tpu.memory_space<vmem>>, %arg6: memref<2x128xf32, #tpu.memory_space<vmem>>) attributes {dimension_semantics = [#tpu.dimension_semantics<parallel>, #tpu.dimension_semantics<arbitrary>], iteration_bounds = array<i64: 1, 1>, scalar_prefetch = 0 : i64, scratch_operands = 0 : i64, tpu.core_type = #tpu.core_type<tc>, window_params = [{transform_indices = @transform_0, window_bounds = array<i64: 16, 32>}, {transform_indices = @transform_1, window_bounds = array<i64: 32, 128>}, {transform_indices = @transform_2, window_bounds = array<i64: 1, 128>}, {transform_indices = @transform_3, window_bounds = array<i64: 16, 128>}, {transform_indices = @transform_4, window_bounds = array<i64: 2, 128>}]} {
    %c0 = arith.constant 0 : index
    %c0_0 = arith.constant 0 : index
    %0 = vector.load %arg2[%c0, %c0_0] : memref<16x32xf32, #tpu.memory_space<vmem>>, vector<16x32xf32>
    %c0_1 = arith.constant 0 : index
    %c0_2 = arith.constant 0 : index
    %1 = vector.load %arg3[%c0_1, %c0_2] : memref<32x128xf32, #tpu.memory_space<vmem>>, vector<32x128xf32>
    %cst = arith.constant dense<0.000000e+00> : vector<16x128xf32>
    %2 = tpu.matmul %0, %1, %cst {dimension_numbers = #tpu.dot_dimension_numbers<[1], [0], [0], [1], [0, 0, 1, 1], [], []>} : vector<16x32xf32>, vector<32x128xf32>, vector<16x128xf32> -> vector<16x128xf32>
    %c0_3 = arith.constant 0 : index
    %c0_4 = arith.constant 0 : index
    %3 = vector.load %arg4[%c0_3, %c0_4] : memref<1x128xf32, #tpu.memory_space<vmem>>, vector<1x128xf32>
    %4 = vector.broadcast %3 : vector<1x128xf32> to vector<16x128xf32>
    %5 = arith.addf %2, %4 : vector<16x128xf32>
    %c0_5 = arith.constant 0 : index
    %c0_6 = arith.constant 0 : index
    %6 = vector.load %arg5[%c0_5, %c0_6] : memref<16x128xf32, #tpu.memory_space<vmem>>, vector<16x128xf32>
    tpu.vector_store %arg5[%c0_5, %c0_6], %5 {strides = array<i32>} : memref<16x128xf32, #tpu.memory_space<vmem>>, vector<16x128xf32>,
    %c0_i32 = arith.constant 0 : i32
    %7 = arith.cmpi eq, %arg1, %c0_i32 : i32
    %8 = arith.extui %7 : i1 to i32
    %c0_i32_7 = arith.constant 0 : i32
    %9 = arith.cmpi ne, %8, %c0_i32_7 : i32
    scf.if %9 {
      %cst_14 = arith.constant 0.000000e+00 : f32
      %19 = vector.broadcast %cst_14 : f32 to vector<2x128xf32>
      %c0_15 = arith.constant 0 : index
      %c0_16 = arith.constant 0 : index
      %20 = vector.load %arg6[%c0_15, %c0_16] : memref<2x128xf32, #tpu.memory_space<vmem>>, vector<2x128xf32>
      tpu.vector_store %arg6[%c0_15, %c0_16], %19 {strides = array<i32>} : memref<2x128xf32, #tpu.memory_space<vmem>>, vector<2x128xf32>,
    } else {
    }
    %cst_8 = arith.constant dense<0.000000e+00> : vector<128xf32>
    %10 = vector.multi_reduction <add>, %5, %cst_8 [0] : vector<16x128xf32> to vector<128xf32>
    %11 = vector.shape_cast %10 : vector<128xf32> to vector<1x128xf32>
    %12 = arith.mulf %5, %5 : vector<16x128xf32>
    %cst_9 = arith.constant dense<0.000000e+00> : vector<128xf32>
    %13 = vector.multi_reduction <add>, %12, %cst_9 [0] : vector<16x128xf32> to vector<128xf32>
    %14 = vector.shape_cast %13 : vector<128xf32> to vector<1x128xf32>
    %c0_10 = arith.constant 0 : index
    %c0_11 = arith.constant 0 : index
    %15 = vector.load %arg6[%c0_10, %c0_11] : memref<2x128xf32, #tpu.memory_space<vmem>>, vector<2x128xf32>
    %16 = tpu.concatenate %11, %14 in 0 : vector<1x128xf32>, vector<1x128xf32> -> vector<2x128xf32>
    %17 = arith.addf %15, %16 : vector<2x128xf32>
    %c0_12 = arith.constant 0 : index
    %c0_13 = arith.constant 0 : index
    %18 = vector.load %arg6[%c0_12, %c0_13] : memref<2x128xf32, #tpu.memory_space<vmem>>, vector<2x128xf32>
    tpu.vector_store %arg6[%c0_12, %c0_13], %17 {strides = array<i32>} : memref<2x128xf32, #tpu.memory_space<vmem>>, vector<2x128xf32>,
    return
  }
  func.func @transform_0(%arg0: i32, %arg1: i32) -> (i32, i32) {
    %c0_i32 = arith.constant 0 : i32
    %c0_i32_0 = arith.constant 0 : i32
    return %arg1, %c0_i32 : i32, i32
  }
  func.func @transform_1(%arg0: i32, %arg1: i32) -> (i32, i32) {
    %c0_i32 = arith.constant 0 : i32
    %c0_i32_0 = arith.constant 0 : i32
    return %c0_i32, %arg0 : i32, i32
  }
  func.func @transform_2(%arg0: i32, %arg1: i32) -> (i32, i32) {
    %c0_i32 = arith.constant 0 : i32
    %c0_i32_0 = arith.constant 0 : i32
    return %c0_i32, %arg0 : i32, i32
  }
  func.func @transform_3(%arg0: i32, %arg1: i32) -> (i32, i32) {
    %c0_i32 = arith.constant 0 : i32
    return %arg1, %arg0 : i32, i32
  }
  func.func @transform_4(%arg0: i32, %arg1: i32) -> (i32, i32) {
    %c0_i32 = arith.constant 0 : i32
    %c0_i32_0 = arith.constant 0 : i32
    return %c0_i32, %arg0 : i32, i32
  }
}

</mosaic_0001>

<bundles_post_ra>
// kernel: tpu_custom_call.1
= control target key start
LH: loop header
LB: loop body
LE: loop exit
PB: predicated region body
PF: predicated region fallthrough
CT: control target
= control target key end

     0   :  { %10 = vsyncpa [#allocation3], 0  ;;  %s328_s0 = inlined_call_operand.hbm [shape: f32[16,32], index: 0, kind: input, shape index: {}]   ;;  %s329_s1 = inlined_call_operand.hbm [shape: f32[32,128], index: 1, kind: input, shape index: {}]   ;;  %s330_s2 = inlined_call_operand.vmem [shape: f32[1,128], index: 2, kind: input, shape index: {}]   ;;  %s331_s3 = inlined_call_operand.hbm [shape: f32[16,128], index: 3, kind: output, shape index: {0}]   ;;  %s332_s4 = inlined_call_operand.hbm [shape: f32[2,128], index: 4, kind: output, shape index: {1}]  }
   0x1   :  { %11 = vsyncpa [#allocation6], 0 }
   0x2   :  { %12 = vsyncpa [#allocation4], 0 }
   0x3   :  { %13 = vsyncpa [#allocation9], 0  ;;  %s18_s17 = sshll.u32 %s328_s0, 4  ;;  %s272_s18 = smov [#allocation2]   ;;  %s19_s17 = int_to_ptr.hbm [resolvable:$true] %s18_s17 }
   0x4   :  { %s20_s19 = sshll.u32 %s272_s18, 4  ;;  %s31_s22 = sshll.u32 %s329_s1, 4  ;;  %s21_s19 = int_to_ptr.vmem [resolvable:$true] %s20_s19  ;;  %s32_s22 = int_to_ptr.hbm [resolvable:$true] %s31_s22 }
   0x5   :  { %s273_s23 = smov 128   ;;  %s274_s24 = smov 8  }
   0x6   :  { %26 = dma.hbm_to_vmem [thread:$0]  %s19_s17, 256, %s21_s19, [#allocation3], %s273_s23, %s273_s23, %s274_s24  }
   0x7   :  { %s275_s25 = smov [#allocation5]  }
   0x8   :  { %s33_s26 = sshll.u32 %s275_s25, 4  ;;  %s34_s26 = int_to_ptr.vmem [resolvable:$true] %s33_s26 }
   0x9   :  { %39 = dma.hbm_to_vmem [thread:$0]  %s32_s22, 512, %s34_s26, [#allocation6], %s273_s23, %s273_s23, %s274_s24  }
   0xa   :  { %264 = dma.done.wait [#allocation3], 256  }
   0xb   :  { %265 = vsyncadd [#allocation3], 4294967040 }
   0xc   :  { %266 = dma.done.wait [#allocation6], 512  }
   0xd   :  { %267 = vsyncadd [#allocation6], 4294966784  ;;  %v55_v0 = vld [vmem:[#allocation5 + $0x18] sm:$0xff]  ;;  %v54_v1 = vld [vmem:[#allocation5 + $0x10] sm:$0xff]  ;;  %vm60_vm0 = vcmask 261120   ;;  %v276_v6 = vmov 0.0  }
   0xe   :  { %79 = vmatpush.msra.mxu0 %v55_v0  ;;  %156 = vmatpush.msra.mxu1 %v55_v0  ;;  %v53_v2 = vld [vmem:[#allocation5 + $0x8] sm:$0xff]  ;;  %v52_v3 = vld [vmem:[#allocation5] sm:$0xff]  ;;  %v50_v4 = vld [vmem:[#allocation2] sm:$0xff]  ;;  %96 = vst [vmem:[#allocation8] sm:$0x3] %v276_v6  ;;  %s277_s27 = smov [#allocation7]  }
   0xf   :  { %v51_v5 = vld [vmem:[#allocation2 + $0x8] sm:$0xff]  ;;  %v167_v7 = vld [vmem:[%s330_s2] ss:$0 sm:$0xff]  ;;  %s122_s28 = sshll.u32 %s277_s27, 4  ;;  %s124_s5 = sshll.u32 %s331_s3, 4  ;;  %vm114_vm1 = vcmask 1040384   ;;  %s123_s28 = int_to_ptr.vmem [resolvable:$true] %s122_s28  ;;  %s125_s5 = int_to_ptr.hbm [resolvable:$true] %s124_s5 }
  0x10   :  { %80 = vmatpush.msra.mxu0 %v54_v1  ;;  %157 = vmatpush.msra.mxu1 %v54_v1  ;;  %s278_s2 = smov [#allocation8]   ;;  %s138_s8 = sshll.u32 %s332_s4, 4  ;;  %s139_s8 = int_to_ptr.hbm [resolvable:$true] %s138_s8 }
  0x11   :  { %s136_s3 = sshll.u32 %s278_s2, 4  ;;  %s137_s3 = int_to_ptr.vmem [resolvable:$true] %s136_s3 }
  0x12   :  { %81 = vmatpush.msra.mxu0 %v53_v2  ;;  %158 = vmatpush.msra.mxu1 %v53_v2 }
  0x14   :  { %82 = vmatpush.msra.mxu0 %v52_v3  ;;  %159 = vmatpush.msra.mxu1 %v52_v3 }
  0x15   :  { %154 = vmatmul.msk.f32.vlgmr.msra.gmra.mxu0 %vm60_vm0, %v50_v4  ;;  %155 = vmatmul.msk.f32.vlgmr.msra.gmra.mxu1 %vm60_vm0, %v51_v5  ;;  %v113_v28 = vld [vmem:[#allocation8] sm:$0x3] }
  0x92   :  { %v84_v8 = vpop.f32.mrf.mxu0  ;;  %v87_v9 = vpop.f32.mrf.mxu1 }
  0x93   :  { %v85_v10 = vadd.f32 %v167_v7, %v84_v8  ;;  %v88_v11 = vadd.f32 %v167_v7, %v87_v9 }
  0x95   :  { %90 = vst [vmem:[#allocation7] sm:$0xff] %v85_v10  ;;  %v104_v12 = vmul.f32 %v85_v10, %v85_v10  ;;  %v97_v13 = vadd.f32 %v88_v11, %v85_v10  ;;  %v105_v14 = vmul.f32 %v88_v11, %v88_v11 }
  0x96   :  { %91 = vst [vmem:[#allocation7 + $0x8] sm:$0xff] %v88_v11 }
  0x97   :  { %v98_v15 = vrot.slane %v97_v13, 4  ;;  %v106_v16 = vadd.f32 %v105_v14, %v104_v12  ;;  %130 = dma.vmem_to_hbm [thread:$0]  %s123_s28, 256, %s125_s5, [#allocation4], %s273_s23, %s273_s23, %s274_s24  }
  0x99   :  { %v99_v17 = vadd.f32 %v98_v15, %v97_v13  ;;  %v107_v18 = vrot.slane %v106_v16, 4 }
  0x9b   :  { %v100_v19 = vrot.slane %v99_v17, 2  ;;  %v108_v20 = vadd.f32 %v107_v18, %v106_v16 }
  0x9d   :  { %v101_v21 = vadd.f32 %v100_v19, %v99_v17  ;;  %v109_v22 = vrot.slane %v108_v20, 2 }
  0x9f   :  { %v102_v23 = vrot.slane %v101_v21, 1  ;;  %v110_v24 = vadd.f32 %v109_v22, %v108_v20 }
  0xa1   :  { %v111_v25 = vrot.slane %v110_v24, 1  ;;  %v103_v26 = vadd.f32 %v102_v23, %v101_v21 }
  0xa3   :  { %v112_v27 = vadd.f32 %v111_v25, %v110_v24 }
  0xa5   :  { %v115_v29 = vsel %vm114_vm1, %v103_v26, %v112_v27 }
  0xa6   :  { %v116_v30 = vadd.f32 %v115_v29, %v113_v28 }
  0xa8   :  { %117 = vst [vmem:[#allocation8] sm:$0x3] %v116_v30 }
  0xa9   :  { %141 = dma.vmem_to_hbm [thread:$0]  %s137_s3, 32, %s139_s8, [#allocation9]  }
  0xaa   :  { %268 = dma.done.wait [#allocation4], 256  }
  0xab   :  { %269 = vsyncadd [#allocation4], 4294967040 }
  0xac   :  { %270 = dma.done.wait [#allocation9], 32  }
  0xad   :  { %271 = vsyncadd [#allocation9], 4294967264 }
  0xae   :  { %150 = vsyncpa [#allocation3], 1 }
  0xaf   :  { %151 = vsyncpa [#allocation6], 1 }
  0xb0   :  { %152 = vsyncpa [#allocation4], 1 }
  0xb1   :  { %153 = vsyncpa [#allocation9], 1 }

</bundles_post_ra>
